<compile_context>
chip_gen: v5e
topology: v5e:2x2
jax: 0.10.0
libtpu: 0.0.40
codegen_flags: <defaults>
</compile_context>

<pallas_src>
import functools

import jax
import jax.numpy as jnp
from jax import lax
from jax.experimental import pallas as pl
from jax.experimental.pallas import tpu as pltpu

_LANES = 128
_MAX_BLOCK_ROWS = 1024   # (1024, 128) f32 block = 512 KiB per input buffer
_NCORES = 2              # leading "parallel" grid axis (megacore on v7x)


def _round_up(a, b):
    return (a + b - 1) // b * b


def _dice_bce_kernel(x_ref, y_ref, out_ref, *, steps_per_core, nblocks,
                     block_rows, full_rows, rem):
    c = pl.program_id(0)          # core / parallel axis
    i = pl.program_id(1)          # sequential streaming axis
    b = c * steps_per_core + i    # global block index (may overrun on tail core)

    @pl.when(i == 0)
    def _init():
        out_ref[...] = jnp.zeros_like(out_ref)

    def accumulate(x, y):
        x = x.astype(jnp.float32)
        y = y.astype(jnp.float32)
        e = jnp.exp(-jnp.abs(x))                 # shared by BCE and sigmoid
        one_plus_e = 1.0 + e
        r = pl.reciprocal(one_plus_e, approx=True)
        s = jnp.where(x >= 0.0, r, e * r)        # sigmoid(x)
        # Numerically stable BCE-with-logits: max(x,0) - x*y + log(1 + exp(-|x|))
        bce = jnp.maximum(x, 0.0) - x * y + jnp.log(one_plus_e)
        # Sublane-only reductions; cross-lane reduction deferred to JAX.
        out_ref[0:1, :] += jnp.sum(bce, axis=0, keepdims=True)
        out_ref[1:2, :] += jnp.sum(s * y, axis=0, keepdims=True)
        out_ref[2:3, :] += jnp.sum(s, axis=0, keepdims=True)
        out_ref[3:4, :] += jnp.sum(y, axis=0, keepdims=True)

    @pl.when(b < nblocks - 1)
    def _interior():                             # fast path, no masking
        accumulate(x_ref[...], y_ref[...])

    @pl.when(b == nblocks - 1)
    def _last():                                 # ragged tail: mask before math
        row = b * block_rows + lax.broadcasted_iota(
            jnp.int32, (block_rows, _LANES), 0)
        if rem:
            lane = lax.broadcasted_iota(jnp.int32, (block_rows, _LANES), 1)
            valid = (row < full_rows) | ((row == full_rows) & (lane < rem))
        else:
            valid = row < full_rows
        # Sanitize BEFORE exp/log so garbage padding can't become NaN/Inf.
        # x=-1e30, y=0 contribute exactly 0 to all four partial sums.
        x = jnp.where(valid, x_ref[...], -1e30)
        y = jnp.where(valid, y_ref[...], 0.0)
        accumulate(x, y)


@functools.partial(jax.jit, static_argnames=("smooth",))
def dice_bce_loss(pred, target, smooth=1e-6):
    """DiceBCELoss forward. pred: logits, target: {0,1} mask, same shape."""
    n = pred.size
    x = pred.reshape(-1)
    y = target.reshape(-1)          # keep native dtypes; cast inside the kernel

    pad = (-n) % _LANES             # tiny lane-alignment pad, only if needed
    if pad:
        x = jnp.pad(x, (0, pad))
        y = jnp.pad(y, (0, pad))
    rows = (n + pad) // _LANES
    x = x.reshape(rows, _LANES)
    y = y.reshape(rows, _LANES)

    block_rows = min(_MAX_BLOCK_ROWS, _round_up(rows, 8))
    nblocks = pl.cdiv(rows, block_rows)
    spc = pl.cdiv(nblocks, _NCORES)              # streaming steps per core

    kernel = functools.partial(
        _dice_bce_kernel,
        steps_per_core=spc, nblocks=nblocks, block_rows=block_rows,
        full_rows=n // _LANES, rem=n % _LANES)

    in_map = lambda c, i: (jnp.minimum(c * spc + i, nblocks - 1), 0)
    blk = pl.BlockSpec((block_rows, _LANES), in_map)

    partials = pl.pallas_call(
        kernel,
        out_shape=jax.ShapeDtypeStruct((_NCORES, 4, _LANES), jnp.float32),
        grid=(_NCORES, spc),
        in_specs=[blk, blk],
        out_specs=pl.BlockSpec((None, 4, _LANES), lambda c, i: (c, 0, 0)),
        compiler_params=pltpu.CompilerParams(
            dimension_semantics=("parallel", "arbitrary")),
        cost_estimate=pl.CostEstimate(
            flops=10 * n,
            transcendentals=2 * n,
            bytes_accessed=n * (pred.dtype.itemsize + target.dtype.itemsize)
            + _NCORES * 4 * _LANES * 4),
    )(x, y)

    sums = jnp.sum(partials, axis=(0, 2))        # (4,) totals across cores+lanes
    bce_mean = sums[0] / jnp.float32(n)
    dice_loss = 1.0 - (2.0 * sums[1] + smooth) / (sums[2] + sums[3] + smooth)
    return bce_mean + dice_loss


def _reference(pred, target, smooth=1e-6):
    x = pred.astype(jnp.float32)
    y = target.astype(jnp.float32)
    bce = jnp.mean(jnp.maximum(x, 0.0) - x * y + jnp.log1p(jnp.exp(-jnp.abs(x))))
    s = jax.nn.sigmoid(x).reshape(-1)
    yf = y.reshape(-1)
    inter = jnp.sum(s * yf)
    dice = 1.0 - (2.0 * inter + smooth) / (jnp.sum(s) + jnp.sum(yf) + smooth)
    return bce + dice


if __name__ == "__main__":
    key = jax.random.PRNGKey(0)
    k1, k2 = jax.random.split(key)
    # NCHW, as a segmentation head would emit: (batch=2, channels=4, 16x16)
    pred = jax.random.normal(k1, (2, 4, 16, 16), dtype=jnp.float32)
    target = jax.random.bernoulli(k2, p=0.3, shape=(2, 4, 16, 16)).astype(jnp.float32)

    loss = dice_bce_loss(pred, target)
    loss = jax.block_until_ready(loss)

    ref = _reference(pred, target)
    # 1e-3 tolerance: the kernel uses the EUP approx reciprocal for sigmoid
    # (~1e-4 relative), everything else matches the exact formulation.
    assert jnp.allclose(loss, ref, rtol=1e-3, atol=1e-3), (loss, ref)
    print("KERNEL_OK")
</pallas_src>

<mosaic_0001>
module attributes {stable_mosaic.version = 11 : i64} {
  func.func @_dice_bce_kernel(%arg0: i32, %arg1: i32, %arg2: memref<16x128xf32, #tpu.memory_space<vmem>>, %arg3: memref<16x128xf32, #tpu.memory_space<vmem>>, %arg4: memref<1x4x128xf32, #tpu.memory_space<vmem>>) attributes {dimension_semantics = [#tpu.dimension_semantics<parallel>, #tpu.dimension_semantics<arbitrary>], iteration_bounds = array<i64: 2, 1>, scalar_prefetch = 0 : i64, scratch_operands = 0 : i64, tpu.core_type = #tpu.core_type<tc>, window_params = [{transform_indices = @transform_0, window_bounds = array<i64: 16, 128>}, {transform_indices = @transform_1, window_bounds = array<i64: 16, 128>}, {transform_indices = @transform_2, window_bounds = array<i64: 1, 4, 128>}]} {
    %c1_i32 = arith.constant 1 : i32
    %0 = arith.muli %arg0, %c1_i32 : i32
    %1 = arith.addi %0, %arg1 : i32
    %c0_i32 = arith.constant 0 : i32
    %2 = arith.cmpi eq, %arg1, %c0_i32 : i32
    %3 = arith.extui %2 : i1 to i32
    %c0_i32_0 = arith.constant 0 : i32
    %4 = arith.cmpi ne, %3, %c0_i32_0 : i32
    scf.if %4 {
      %cst = arith.constant 0.000000e+00 : f32
      %11 = vector.broadcast %cst : f32 to vector<4x128xf32>
      %c0 = arith.constant 0 : index
      %c0_5 = arith.constant 0 : index
      %c0_6 = arith.constant 0 : index
      %12 = vector.load %arg4[%c0, %c0_5, %c0_6] : memref<1x4x128xf32, #tpu.memory_space<vmem>>, vector<1x4x128xf32>
      %13 = vector.shape_cast %12 : vector<1x4x128xf32> to vector<4x128xf32>
      %14 = vector.shape_cast %11 : vector<4x128xf32> to vector<1x4x128xf32>
      tpu.vector_store %arg4[%c0, %c0_5, %c0_6], %14 {strides = array<i32>} : memref<1x4x128xf32, #tpu.memory_space<vmem>>, vector<1x4x128xf32>,
    } else {
    }
    %c0_i32_1 = arith.constant 0 : i32
    %5 = arith.cmpi slt, %1, %c0_i32_1 : i32
    %6 = arith.extui %5 : i1 to i32
    %c0_i32_2 = arith.constant 0 : i32
    %7 = arith.cmpi ne, %6, %c0_i32_2 : i32
    scf.if %7 {
      %c0 = arith.constant 0 : index
      %c0_5 = arith.constant 0 : index
      %11 = vector.load %arg2[%c0, %c0_5] : memref<16x128xf32, #tpu.memory_space<vmem>>, vector<16x128xf32>
      %c0_6 = arith.constant 0 : index
      %c0_7 = arith.constant 0 : index
      %12 = vector.load %arg3[%c0_6, %c0_7] : memref<16x128xf32, #tpu.memory_space<vmem>>, vector<16x128xf32>
      %13 = math.absf %11 : vector<16x128xf32>
      %cst = arith.constant 0.000000e+00 : f32
      %14 = vector.broadcast %cst : f32 to vector<16x128xf32>
      %15 = arith.subf %14, %13 : vector<16x128xf32>
      %16 = math.exp %15 : vector<16x128xf32>
      %cst_8 = arith.constant 1.000000e+00 : f32
      %17 = vector.broadcast %cst_8 : f32 to vector<16x128xf32>
      %18 = arith.addf %17, %16 : vector<16x128xf32>
      %19 = tpu.reciprocal %18 {approx = true} : vector<16x128xf32> -> vector<16x128xf32>
      %cst_9 = arith.constant 0.000000e+00 : f32
      %20 = vector.broadcast %cst_9 : f32 to vector<16x128xf32>
      %21 = arith.cmpf oge, %11, %20 : vector<16x128xf32>
      %22 = arith.mulf %16, %19 : vector<16x128xf32>
      %23 = arith.select %21, %19, %22 : vector<16x128xi1>, vector<16x128xf32>
      %cst_10 = arith.constant 0.000000e+00 : f32
      %24 = vector.broadcast %cst_10 : f32 to vector<16x128xf32>
      %25 = arith.maximumf %11, %24 : vector<16x128xf32>
      %26 = arith.mulf %11, %12 : vector<16x128xf32>
      %27 = arith.subf %25, %26 : vector<16x128xf32>
      %28 = math.log %18 : vector<16x128xf32>
      %29 = arith.addf %27, %28 : vector<16x128xf32>
      %c0_11 = arith.constant 0 : index
      %c0_12 = arith.constant 0 : index
      %c0_13 = arith.constant 0 : index
      %30 = vector.load %arg4[%c0_11, %c0_12, %c0_13] : memref<1x4x128xf32, #tpu.memory_space<vmem>>, vector<1x1x128xf32>
      %31 = vector.shape_cast %30 : vector<1x1x128xf32> to vector<1x128xf32>
      %cst_14 = arith.constant dense<0.000000e+00> : vector<128xf32>
      %32 = vector.multi_reduction <add>, %29, %cst_14 [0] : vector<16x128xf32> to vector<128xf32>
      %33 = vector.shape_cast %32 : vector<128xf32> to vector<1x128xf32>
      %34 = arith.addf %31, %33 : vector<1x128xf32>
      %c0_15 = arith.constant 0 : index
      %c0_16 = arith.constant 0 : index
      %c0_17 = arith.constant 0 : index
      %35 = vector.load %arg4[%c0_15, %c0_16, %c0_17] : memref<1x4x128xf32, #tpu.memory_space<vmem>>, vector<1x1x128xf32>
      %36 = vector.shape_cast %35 : vector<1x1x128xf32> to vector<1x128xf32>
      %37 = vector.shape_cast %34 : vector<1x128xf32> to vector<1x1x128xf32>
      tpu.vector_store %arg4[%c0_15, %c0_16, %c0_17], %37 {strides = array<i32>} : memref<1x4x128xf32, #tpu.memory_space<vmem>>, vector<1x1x128xf32>,
      %c0_18 = arith.constant 0 : index
      %c1 = arith.constant 1 : index
      %c0_19 = arith.constant 0 : index
      %38 = vector.load %arg4[%c0_18, %c1, %c0_19] : memref<1x4x128xf32, #tpu.memory_space<vmem>>, vector<1x1x128xf32>
      %39 = vector.shape_cast %38 : vector<1x1x128xf32> to vector<1x128xf32>
      %40 = arith.mulf %23, %12 : vector<16x128xf32>
      %cst_20 = arith.constant dense<0.000000e+00> : vector<128xf32>
      %41 = vector.multi_reduction <add>, %40, %cst_20 [0] : vector<16x128xf32> to vector<128xf32>
      %42 = vector.shape_cast %41 : vector<128xf32> to vector<1x128xf32>
      %43 = arith.addf %39, %42 : vector<1x128xf32>
      %c0_21 = arith.constant 0 : index
      %c1_22 = arith.constant 1 : index
      %c0_23 = arith.constant 0 : index
      %44 = vector.load %arg4[%c0_21, %c1_22, %c0_23] : memref<1x4x128xf32, #tpu.memory_space<vmem>>, vector<1x1x128xf32>
      %45 = vector.shape_cast %44 : vector<1x1x128xf32> to vector<1x128xf32>
      %46 = vector.shape_cast %43 : vector<1x128xf32> to vector<1x1x128xf32>
      tpu.vector_store %arg4[%c0_21, %c1_22, %c0_23], %46 {strides = array<i32>} : memref<1x4x128xf32, #tpu.memory_space<vmem>>, vector<1x1x128xf32>,
      %c0_24 = arith.constant 0 : index
      %c2 = arith.constant 2 : index
      %c0_25 = arith.constant 0 : index
      %47 = vector.load %arg4[%c0_24, %c2, %c0_25] : memref<1x4x128xf32, #tpu.memory_space<vmem>>, vector<1x1x128xf32>
      %48 = vector.shape_cast %47 : vector<1x1x128xf32> to vector<1x128xf32>
      %cst_26 = arith.constant dense<0.000000e+00> : vector<128xf32>
      %49 = vector.multi_reduction <add>, %23, %cst_26 [0] : vector<16x128xf32> to vector<128xf32>
      %50 = vector.shape_cast %49 : vector<128xf32> to vector<1x128xf32>
      %51 = arith.addf %48, %50 : vector<1x128xf32>
      %c0_27 = arith.constant 0 : index
      %c2_28 = arith.constant 2 : index
      %c0_29 = arith.constant 0 : index
      %52 = vector.load %arg4[%c0_27, %c2_28, %c0_29] : memref<1x4x128xf32, #tpu.memory_space<vmem>>, vector<1x1x128xf32>
      %53 = vector.shape_cast %52 : vector<1x1x128xf32> to vector<1x128xf32>
      %54 = vector.shape_cast %51 : vector<1x128xf32> to vector<1x1x128xf32>
      tpu.vector_store %arg4[%c0_27, %c2_28, %c0_29], %54 {strides = array<i32>} : memref<1x4x128xf32, #tpu.memory_space<vmem>>, vector<1x1x128xf32>,
      %c0_30 = arith.constant 0 : index
      %c3 = arith.constant 3 : index
      %c0_31 = arith.constant 0 : index
      %55 = vector.load %arg4[%c0_30, %c3, %c0_31] : memref<1x4x128xf32, #tpu.memory_space<vmem>>, vector<1x1x128xf32>
      %56 = vector.shape_cast %55 : vector<1x1x128xf32> to vector<1x128xf32>
      %cst_32 = arith.constant dense<0.000000e+00> : vector<128xf32>
      %57 = vector.multi_reduction <add>, %12, %cst_32 [0] : vector<16x128xf32> to vector<128xf32>
      %58 = vector.shape_cast %57 : vector<128xf32> to vector<1x128xf32>
      %59 = arith.addf %56, %58 : vector<1x128xf32>
      %c0_33 = arith.constant 0 : index
      %c3_34 = arith.constant 3 : index
      %c0_35 = arith.constant 0 : index
      %60 = vector.load %arg4[%c0_33, %c3_34, %c0_35] : memref<1x4x128xf32, #tpu.memory_space<vmem>>, vector<1x1x128xf32>
      %61 = vector.shape_cast %60 : vector<1x1x128xf32> to vector<1x128xf32>
      %62 = vector.shape_cast %59 : vector<1x128xf32> to vector<1x1x128xf32>
      tpu.vector_store %arg4[%c0_33, %c3_34, %c0_35], %62 {strides = array<i32>} : memref<1x4x128xf32, #tpu.memory_space<vmem>>, vector<1x1x128xf32>,
    } else {
    }
    %c0_i32_3 = arith.constant 0 : i32
    %8 = arith.cmpi eq, %1, %c0_i32_3 : i32
    %9 = arith.extui %8 : i1 to i32
    %c0_i32_4 = arith.constant 0 : i32
    %10 = arith.cmpi ne, %9, %c0_i32_4 : i32
    scf.if %10 {
      %c16_i32 = arith.constant 16 : i32
      %11 = arith.muli %1, %c16_i32 : i32
      %12 = tpu.iota {dimensions = array<i32: 0>} : vector<16x128xi32>
      %13 = vector.broadcast %11 : i32 to vector<16x128xi32>
      %14 = arith.addi %13, %12 : vector<16x128xi32>
      %c16_i32_5 = arith.constant 16 : i32
      %15 = vector.broadcast %c16_i32_5 : i32 to vector<16x128xi32>
      %16 = arith.cmpi slt, %14, %15 : vector<16x128xi32>
      %c0 = arith.constant 0 : index
      %c0_6 = arith.constant 0 : index
      %17 = vector.load %arg2[%c0, %c0_6] : memref<16x128xf32, #tpu.memory_space<vmem>>, vector<16x128xf32>
      %cst = arith.constant -1.000000e+30 : f32
      %18 = vector.broadcast %cst : f32 to vector<16x128xf32>
      %19 = arith.select %16, %17, %18 : vector<16x128xi1>, vector<16x128xf32>
      %c0_7 = arith.constant 0 : index
      %c0_8 = arith.constant 0 : index
      %20 = vector.load %arg3[%c0_7, %c0_8] : memref<16x128xf32, #tpu.memory_space<vmem>>, vector<16x128xf32>
      %cst_9 = arith.constant 0.000000e+00 : f32
      %21 = vector.broadcast %cst_9 : f32 to vector<16x128xf32>
      %22 = arith.select %16, %20, %21 : vector<16x128xi1>, vector<16x128xf32>
      %23 = math.absf %19 : vector<16x128xf32>
      %cst_10 = arith.constant 0.000000e+00 : f32
      %24 = vector.broadcast %cst_10 : f32 to vector<16x128xf32>
      %25 = arith.subf %24, %23 : vector<16x128xf32>
      %26 = math.exp %25 : vector<16x128xf32>
      %cst_11 = arith.constant 1.000000e+00 : f32
      %27 = vector.broadcast %cst_11 : f32 to vector<16x128xf32>
      %28 = arith.addf %27, %26 : vector<16x128xf32>
      %29 = tpu.reciprocal %28 {approx = true} : vector<16x128xf32> -> vector<16x128xf32>
      %cst_12 = arith.constant 0.000000e+00 : f32
      %30 = vector.broadcast %cst_12 : f32 to vector<16x128xf32>
      %31 = arith.cmpf oge, %19, %30 : vector<16x128xf32>
      %32 = arith.mulf %26, %29 : vector<16x128xf32>
      %33 = arith.select %31, %29, %32 : vector<16x128xi1>, vector<16x128xf32>
      %cst_13 = arith.constant 0.000000e+00 : f32
      %34 = vector.broadcast %cst_13 : f32 to vector<16x128xf32>
      %35 = arith.maximumf %19, %34 : vector<16x128xf32>
      %36 = arith.mulf %19, %22 : vector<16x128xf32>
      %37 = arith.subf %35, %36 : vector<16x128xf32>
      %38 = math.log %28 : vector<16x128xf32>
      %39 = arith.addf %37, %38 : vector<16x128xf32>
      %c0_14 = arith.constant 0 : index
      %c0_15 = arith.constant 0 : index
      %c0_16 = arith.constant 0 : index
      %40 = vector.load %arg4[%c0_14, %c0_15, %c0_16] : memref<1x4x128xf32, #tpu.memory_space<vmem>>, vector<1x1x128xf32>
      %41 = vector.shape_cast %40 : vector<1x1x128xf32> to vector<1x128xf32>
      %cst_17 = arith.constant dense<0.000000e+00> : vector<128xf32>
      %42 = vector.multi_reduction <add>, %39, %cst_17 [0] : vector<16x128xf32> to vector<128xf32>
      %43 = vector.shape_cast %42 : vector<128xf32> to vector<1x128xf32>
      %44 = arith.addf %41, %43 : vector<1x128xf32>
      %c0_18 = arith.constant 0 : index
      %c0_19 = arith.constant 0 : index
      %c0_20 = arith.constant 0 : index
      %45 = vector.load %arg4[%c0_18, %c0_19, %c0_20] : memref<1x4x128xf32, #tpu.memory_space<vmem>>, vector<1x1x128xf32>
      %46 = vector.shape_cast %45 : vector<1x1x128xf32> to vector<1x128xf32>
      %47 = vector.shape_cast %44 : vector<1x128xf32> to vector<1x1x128xf32>
      tpu.vector_store %arg4[%c0_18, %c0_19, %c0_20], %47 {strides = array<i32>} : memref<1x4x128xf32, #tpu.memory_space<vmem>>, vector<1x1x128xf32>,
      %c0_21 = arith.constant 0 : index
      %c1 = arith.constant 1 : index
      %c0_22 = arith.constant 0 : index
      %48 = vector.load %arg4[%c0_21, %c1, %c0_22] : memref<1x4x128xf32, #tpu.memory_space<vmem>>, vector<1x1x128xf32>
      %49 = vector.shape_cast %48 : vector<1x1x128xf32> to vector<1x128xf32>
      %50 = arith.mulf %33, %22 : vector<16x128xf32>
      %cst_23 = arith.constant dense<0.000000e+00> : vector<128xf32>
      %51 = vector.multi_reduction <add>, %50, %cst_23 [0] : vector<16x128xf32> to vector<128xf32>
      %52 = vector.shape_cast %51 : vector<128xf32> to vector<1x128xf32>
      %53 = arith.addf %49, %52 : vector<1x128xf32>
      %c0_24 = arith.constant 0 : index
      %c1_25 = arith.constant 1 : index
      %c0_26 = arith.constant 0 : index
      %54 = vector.load %arg4[%c0_24, %c1_25, %c0_26] : memref<1x4x128xf32, #tpu.memory_space<vmem>>, vector<1x1x128xf32>
      %55 = vector.shape_cast %54 : vector<1x1x128xf32> to vector<1x128xf32>
      %56 = vector.shape_cast %53 : vector<1x128xf32> to vector<1x1x128xf32>
      tpu.vector_store %arg4[%c0_24, %c1_25, %c0_26], %56 {strides = array<i32>} : memref<1x4x128xf32, #tpu.memory_space<vmem>>, vector<1x1x128xf32>,
      %c0_27 = arith.constant 0 : index
      %c2 = arith.constant 2 : index
      %c0_28 = arith.constant 0 : index
      %57 = vector.load %arg4[%c0_27, %c2, %c0_28] : memref<1x4x128xf32, #tpu.memory_space<vmem>>, vector<1x1x128xf32>
      %58 = vector.shape_cast %57 : vector<1x1x128xf32> to vector<1x128xf32>
      %cst_29 = arith.constant dense<0.000000e+00> : vector<128xf32>
      %59 = vector.multi_reduction <add>, %33, %cst_29 [0] : vector<16x128xf32> to vector<128xf32>
      %60 = vector.shape_cast %59 : vector<128xf32> to vector<1x128xf32>
      %61 = arith.addf %58, %60 : vector<1x128xf32>
      %c0_30 = arith.constant 0 : index
      %c2_31 = arith.constant 2 : index
      %c0_32 = arith.constant 0 : index
      %62 = vector.load %arg4[%c0_30, %c2_31, %c0_32] : memref<1x4x128xf32, #tpu.memory_space<vmem>>, vector<1x1x128xf32>
      %63 = vector.shape_cast %62 : vector<1x1x128xf32> to vector<1x128xf32>
      %64 = vector.shape_cast %61 : vector<1x128xf32> to vector<1x1x128xf32>
      tpu.vector_store %arg4[%c0_30, %c2_31, %c0_32], %64 {strides = array<i32>} : memref<1x4x128xf32, #tpu.memory_space<vmem>>, vector<1x1x128xf32>,
      %c0_33 = arith.constant 0 : index
      %c3 = arith.constant 3 : index
      %c0_34 = arith.constant 0 : index
      %65 = vector.load %arg4[%c0_33, %c3, %c0_34] : memref<1x4x128xf32, #tpu.memory_space<vmem>>, vector<1x1x128xf32>
      %66 = vector.shape_cast %65 : vector<1x1x128xf32> to vector<1x128xf32>
      %cst_35 = arith.constant dense<0.000000e+00> : vector<128xf32>
      %67 = vector.multi_reduction <add>, %22, %cst_35 [0] : vector<16x128xf32> to vector<128xf32>
      %68 = vector.shape_cast %67 : vector<128xf32> to vector<1x128xf32>
      %69 = arith.addf %66, %68 : vector<1x128xf32>
      %c0_36 = arith.constant 0 : index
      %c3_37 = arith.constant 3 : index
      %c0_38 = arith.constant 0 : index
      %70 = vector.load %arg4[%c0_36, %c3_37, %c0_38] : memref<1x4x128xf32, #tpu.memory_space<vmem>>, vector<1x1x128xf32>
      %71 = vector.shape_cast %70 : vector<1x1x128xf32> to vector<1x128xf32>
      %72 = vector.shape_cast %69 : vector<1x128xf32> to vector<1x1x128xf32>
      tpu.vector_store %arg4[%c0_36, %c3_37, %c0_38], %72 {strides = array<i32>} : memref<1x4x128xf32, #tpu.memory_space<vmem>>, vector<1x1x128xf32>,
    } else {
    }
    return
  }
  func.func @transform_0(%arg0: i32, %arg1: i32) -> (i32, i32) {
    %c1_i32 = arith.constant 1 : i32
    %0 = arith.muli %arg0, %c1_i32 : i32
    %1 = arith.addi %0, %arg1 : i32
    %c0_i32 = arith.constant 0 : i32
    %2 = arith.minsi %1, %c0_i32 : i32
    %c0_i32_0 = arith.constant 0 : i32
    %c0_i32_1 = arith.constant 0 : i32
    return %2, %c0_i32_0 : i32, i32
  }
  func.func @transform_1(%arg0: i32, %arg1: i32) -> (i32, i32) {
    %c1_i32 = arith.constant 1 : i32
    %0 = arith.muli %arg0, %c1_i32 : i32
    %1 = arith.addi %0, %arg1 : i32
    %c0_i32 = arith.constant 0 : i32
    %2 = arith.minsi %1, %c0_i32 : i32
    %c0_i32_0 = arith.constant 0 : i32
    %c0_i32_1 = arith.constant 0 : i32
    return %2, %c0_i32_0 : i32, i32
  }
  func.func @transform_2(%arg0: i32, %arg1: i32) -> (i32, i32, i32) {
    %c0_i32 = arith.constant 0 : i32
    %c0_i32_0 = arith.constant 0 : i32
    %c0_i32_1 = arith.constant 0 : i32
    return %arg0, %c0_i32, %c0_i32_0 : i32, i32, i32
  }
}

</mosaic_0001>

<bundles_post_ra>
// kernel: dice_bce_loss.1
= control target key start
LH: loop header
LB: loop body
LE: loop exit
PB: predicated region body
PF: predicated region fallthrough
CT: control target
= control target key end

     0   :  { %s576_s9 = smov 0   ;;  %s578_s10 = smov 0   ;;  %s652_s0 = inlined_call_operand.vmem [shape: f32[16,128], index: 0, kind: input, shape index: {}]   ;;  %s653_s1 = inlined_call_operand.vmem [shape: f32[16,128], index: 1, kind: input, shape index: {}]   ;;  %s654_s2 = inlined_call_operand.vmem [shape: f32[2,4,128], index: 2, kind: output, shape index: {}]  }
   0x1   :  { %s580_s11 = smov 0  }
   0x2 LB: > { %s24_s12 = sadd.s32 1, %s554_s10  ;;  %p476_p0 = scmp.ge.s32.totalorder %s558_s11, 1  ;;  %s558_s11 = sphi %s580_s11, %s12_s11   ;;  %s554_s10 = sphi %s578_s10, %s656_s10   ;;  %s550_s9 = sphi %s576_s9, %s655_s9  }
   0x3   : > { %p26_p1 = scmp.ge.s32.totalorder %s24_s12, 2  ;;  %p160_p2 = scmp.lt.s32.totalorder %s558_s11, 3 }
   0x5   : > { %s658_s12 = smov (%p26_p1, %s24_s12), 0  ;;  %p161_p3 = pnand %p476_p0, %p160_p2 }
   0x6   : > { %p193_p4 = scmp.lt.s32.totalorder (!%p161_p3), %s550_s9, 0  ;;  %p216_p5 = scmp.lt.s32.totalorder (!%p161_p3), %s550_s9, 1 }
   0x7   : > { %164 = sbr.rel (%p161_p3) target bundleno = 130 (0x82), region = 28  ;;  %p482_p7 = scmp.ge.s32.totalorder (!%p161_p3), %s550_s9, 0 }
   0xc   : > { %s194_s13 = scalar_select %p193_p4, %s550_s9, 0  ;;  %v560_v0 = vmov 0.0  }
   0xd   : > { %s217_s14 = scalar_select %p216_p5, %s550_s9, 1 }
   0xe   : > { %s477_s15 = sshll.u32 %s194_s13, 1 }
   0xf   : > { %p196_p6 = scmp.lt.s32.totalorder %s477_s15, 1  ;;  %s481_s16 = sshll.u32 %s217_s14, 2 }
  0x10   : > { %s603_s19 = scalar_lea.vmem %s654_s2, %s481_s16  ;;  %229 = sbr.rel (%p482_p7) target bundleno = 68 (0x44), region = 36 }
  0x11   : > { %s660_s15 = smov (!%p196_p6, %s477_s15), 1  ;;  %225 = vst [vmem:[%s603_s19] sm:$0xf] %v560_v0 }
  0x12   : > { %s478_s20 = sshll.u32 %s660_s15, 3 }
  0x13   : > { %s609_s23 = scalar_lea.vmem %s652_s0, %s478_s20  ;;  %s614_s26 = scalar_lea.vmem %s653_s1, %s478_s20 }
  0x15   : > { %v230_v1 = vld [vmem:[%s609_s23] sm:$0xff]  ;;  %v231_v2 = vld [vmem:[%s609_s23 + $0x8] sm:$0xff] }
  0x16   : > { %v234_v3 = vand.u32 2147483647, %v230_v1  ;;  %v235_v4 = vand.u32 2147483647, %v231_v2  ;;  %v232_v5 = vld [vmem:[%s614_s26] sm:$0xff]  ;;  %v233_v6 = vld [vmem:[%s614_s26 + $0x8] sm:$0xff] }
  0x17   : > { %v297_v9 = vadd.f32 %v233_v6, %v232_v5  ;;  %v252_v24 = vmax.f32 %v230_v1, 0.0  ;;  %v254_v25 = vmul.f32 %v232_v5, %v230_v1  ;;  %v253_v26 = vmax.f32 %v231_v2, 0.0 }
  0x18   : > { %v236_v7 = vsub.f32 0.0, %v234_v3  ;;  %v237_v8 = vsub.f32 0.0, %v235_v4  ;;  %v296_v20 = vld [vmem:[%s603_s19 + $0x3] sm:$0x1]  ;;  %v255_v27 = vmul.f32 %v233_v6, %v231_v2  ;;  %vm246_vm0 = vcmp.ge.f32.partialorder %v230_v1, 0.0 }
  0x19   : > { %v298_v12 = vrot.slane %v297_v9, 4  ;;  %v256_v30 = vsub.f32 %v252_v24, %v254_v25  ;;  %vm247_vm1 = vcmp.ge.f32.partialorder %v231_v2, 0.0  ;;  %v286_v60 = vld [vmem:[%s603_s19 + $0x2] sm:$0x1]  ;;  %v274_v0 = vld [vmem:[%s603_s19 + $0x1] sm:$0x1] }
  0x1a   : > { %v238_v10 = vmul.f32 1.442695, %v236_v7  ;;  %v240_v11 = vmul.f32 1.442695, %v237_v8  ;;  %v257_v33 = vsub.f32 %v253_v26, %v255_v27  ;;  %v264_v1 = vld [vmem:[%s603_s19] sm:$0x1] }
  0x1b   : > { %v299_v13 = vadd.f32 %v298_v12, %v297_v9 }
  0x1c   : > { %512 = vpow2.f32 %v238_v10 }
  0x1d   : > { %514 = vpow2.f32 %v240_v11  ;;  %v300_v14 = vrot.slane %v299_v13, 2 }
  0x1f   : > { %v301_v15 = vadd.f32 %v300_v14, %v299_v13 }
  0x21   : > { %v302_v17 = vrot.slane %v301_v15, 1 }
  0x22   : > { %v513_v16 = vpop.eup %512 }
  0x23   : > { %v515_v18 = vpop.eup %514  ;;  %v242_v19 = vadd.f32 1.0, %v513_v16  ;;  %v303_v22 = vadd.f32 %v302_v17, %v301_v15 }
  0x24   : > { %v243_v21 = vadd.f32 1.0, %v515_v18 }
  0x25   : > { %516 = vrcp.f32 %v242_v19  ;;  %v304_v23 = vadd.f32 %v303_v22, %v296_v20 }
  0x26   : > { %518 = vrcp.f32 %v243_v21 }
  0x27   : > { %520 = vlog2.f32 %v242_v19  ;;  %305 = vst [vmem:[%s603_s19 + $0x3] sm:$0x1] %v304_v23 }
  0x28   : > { %522 = vlog2.f32 %v243_v21 }
  0x2b   : > { %v517_v28 = vpop.eup %516 }
  0x2c   : > { %v519_v29 = vpop.eup %518  ;;  %v248_v31 = vmul.f32 %v517_v28, %v513_v16 }
  0x2d   : > { %v521_v32 = vpop.eup %520  ;;  %v249_v34 = vmul.f32 %v519_v29, %v515_v18 }
  0x2e   : > { %v523_v35 = vpop.eup %522  ;;  %v259_v36 = vmul.f32 0.6931472, %v521_v32  ;;  %v250_v37 = vsel %vm246_vm0, %v517_v28, %v248_v31 }
  0x2f   : > { %v261_v38 = vmul.f32 0.6931472, %v523_v35  ;;  %v251_v39 = vsel %vm247_vm1, %v519_v29, %v249_v34  ;;  %v275_v40 = vmul.f32 %v250_v37, %v232_v5 }
  0x30   : > { %v262_v41 = vadd.f32 %v259_v36, %v256_v30  ;;  %v276_v42 = vmul.f32 %v251_v39, %v233_v6  ;;  %v287_v43 = vadd.f32 %v251_v39, %v250_v37 }
  0x31   : > { %v263_v44 = vadd.f32 %v261_v38, %v257_v33 }
  0x32   : > { %v277_v45 = vadd.f32 %v276_v42, %v275_v40  ;;  %v288_v46 = vrot.slane %v287_v43, 4 }
  0x33   : > { %v265_v47 = vadd.f32 %v263_v44, %v262_v41 }
  0x34   : > { %v278_v48 = vrot.slane %v277_v45, 4  ;;  %v289_v49 = vadd.f32 %v288_v46, %v287_v43 }
  0x35   : > { %v266_v50 = vrot.slane %v265_v47, 4 }
  0x36   : > { %v279_v51 = vadd.f32 %v278_v48, %v277_v45  ;;  %v290_v52 = vrot.slane %v289_v49, 2 }
  0x37   : > { %v267_v53 = vadd.f32 %v266_v50, %v265_v47 }
  0x38   : > { %v280_v54 = vrot.slane %v279_v51, 2  ;;  %v291_v55 = vadd.f32 %v290_v52, %v289_v49 }
  0x39   : > { %v268_v56 = vrot.slane %v267_v53, 2 }
  0x3a   : > { %v281_v57 = vadd.f32 %v280_v54, %v279_v51  ;;  %v292_v58 = vrot.slane %v291_v55, 1 }
  0x3b   : > { %v269_v59 = vadd.f32 %v268_v56, %v267_v53 }
  0x3c   : > { %v282_v61 = vrot.slane %v281_v57, 1  ;;  %v293_v62 = vadd.f32 %v292_v58, %v291_v55 }
  0x3d   : > { %v270_v63 = vrot.slane %v269_v59, 1 }
  0x3e   : > { %v283_v2 = vadd.f32 %v282_v61, %v281_v57  ;;  %v294_v3 = vadd.f32 %v293_v62, %v286_v60 }
  0x3f   : > { %v271_v4 = vadd.f32 %v270_v63, %v269_v59 }
  0x40   : > { %v284_v5 = vadd.f32 %v283_v2, %v274_v0  ;;  %295 = vst [vmem:[%s603_s19 + $0x2] sm:$0x1] %v294_v3 }
  0x41   : > { %v272_v6 = vadd.f32 %v271_v4, %v264_v1 }
  0x42   : > { %285 = vst [vmem:[%s603_s19 + $0x1] sm:$0x1] %v284_v5 }
  0x43   : > { %273 = vst [vmem:[%s603_s19] sm:$0x1] %v272_v6 }
  0x44 PF: > { %p483_p8 = scmp.ne.s32.totalorder %s550_s9, 0 }
  0x45   : > { %s484_s27 = sshll.u32 (!%p483_p8), %s550_s9, 4 }
  0x46   : > { %309 = sbr.rel (%p483_p8) target bundleno = 130 (0x82), region = 40 }
  0x4b   : > { %v311_v7 = vlaneseq  ;;  %v314_v8 = vstv %s484_s27  ;;  %v319_v12 = vld [vmem:[%s609_s23] sm:$0xff]  ;;  %v320_v14 = vld [vmem:[%s609_s23 + $0x8] sm:$0xff] }
  0x4c   : > { %v323_v16 = vld [vmem:[%s614_s26] sm:$0xff]  ;;  %v324_v17 = vld [vmem:[%s614_s26 + $0x8] sm:$0xff] }
  0x4d   : > { %v312_v9 = vshrl.u32 %v311_v7, 7  ;;  %v389_v36 = vld [vmem:[%s603_s19 + $0x3] sm:$0x1] }
  0x4f   : > { %v313_v10 = vadd.s32 8, %v312_v9  ;;  %v315_v11 = vadd.s32 %v314_v8, %v312_v9 }
  0x51   : > { %v316_v13 = vadd.s32 %v314_v8, %v313_v10  ;;  %vm317_vm2 = vcmp.lt.s32.totalorder %v315_v11, 16 }
  0x52   : > { %v321_v15 = vsel %vm317_vm2, %v319_v12, -1e+30  ;;  %v325_v20 = vsel %vm317_vm2, %v323_v16, 0.0  ;;  %v379_v12 = vld [vmem:[%s603_s19 + $0x2] sm:$0x1] }
  0x53   : > { %vm318_vm3 = vcmp.lt.s32.totalorder %v316_v13, 16  ;;  %v327_v18 = vand.u32 2147483647, %v321_v15  ;;  %v345_v39 = vmax.f32 %v321_v15, 0.0  ;;  %v347_v40 = vmul.f32 %v325_v20, %v321_v15  ;;  %v357_v16 = vld [vmem:[%s603_s19] sm:$0x1] }
  0x54   : > { %v322_v19 = vsel %vm318_vm3, %v320_v14, -1e+30  ;;  %v326_v21 = vsel %vm318_vm3, %v324_v17, 0.0  ;;  %vm339_vm4 = vcmp.ge.f32.partialorder %v321_v15, 0.0  ;;  %v367_v17 = vld [vmem:[%s603_s19 + $0x1] sm:$0x1] }
  0x55   : > { %v328_v22 = vand.u32 2147483647, %v322_v19  ;;  %v329_v23 = vsub.f32 0.0, %v327_v18  ;;  %v390_v24 = vadd.f32 %v326_v21, %v325_v20  ;;  %v346_v42 = vmax.f32 %v322_v19, 0.0 }
  0x56   : > { %v348_v43 = vmul.f32 %v326_v21, %v322_v19  ;;  %v349_v45 = vsub.f32 %v345_v39, %v347_v40  ;;  %vm340_vm5 = vcmp.ge.f32.partialorder %v322_v19, 0.0 }
  0x57   : > { %v330_v25 = vsub.f32 0.0, %v328_v22  ;;  %v331_v26 = vmul.f32 1.442695, %v329_v23  ;;  %v391_v27 = vrot.slane %v390_v24, 4 }
  0x58   : > { %v350_v49 = vsub.f32 %v346_v42, %v348_v43 }
  0x59   : > { %524 = vpow2.f32 %v331_v26  ;;  %v333_v28 = vmul.f32 1.442695, %v330_v25  ;;  %v392_v29 = vadd.f32 %v391_v27, %v390_v24 }
  0x5b   : > { %526 = vpow2.f32 %v333_v28  ;;  %v393_v30 = vrot.slane %v392_v29, 2 }
  0x5d   : > { %v394_v31 = vadd.f32 %v393_v30, %v392_v29 }
  0x5f   : > { %v525_v32 = vpop.eup %524  ;;  %v395_v34 = vrot.slane %v394_v31, 1 }
  0x60   : > { %v335_v33 = vadd.f32 1.0, %v525_v32 }
  0x61   : > { %v527_v35 = vpop.eup %526  ;;  %v396_v38 = vadd.f32 %v395_v34, %v394_v31 }
  0x62   : > { %v336_v37 = vadd.f32 1.0, %v527_v35  ;;  %528 = vrcp.f32 %v335_v33 }
  0x63   : > { %530 = vlog2.f32 %v335_v33  ;;  %v397_v41 = vadd.f32 %v396_v38, %v389_v36 }
  0x64   : > { %532 = vrcp.f32 %v336_v37 }
  0x65   : > { %534 = vlog2.f32 %v336_v37  ;;  %398 = vst [vmem:[%s603_s19 + $0x3] sm:$0x1] %v397_v41 }
  0x68   : > { %v529_v44 = vpop.eup %528 }
  0x69   : > { %v531_v46 = vpop.eup %530  ;;  %v341_v47 = vmul.f32 %v529_v44, %v525_v32 }
  0x6a   : > { %v533_v48 = vpop.eup %532  ;;  %v352_v50 = vmul.f32 0.6931472, %v531_v46 }
  0x6b   : > { %v535_v51 = vpop.eup %534  ;;  %v342_v52 = vmul.f32 %v533_v48, %v527_v35  ;;  %v343_v53 = vsel %vm339_vm4, %v529_v44, %v341_v47 }
  0x6c   : > { %v354_v54 = vmul.f32 0.6931472, %v535_v51  ;;  %v355_v55 = vadd.f32 %v352_v50, %v349_v45  ;;  %v368_v56 = vmul.f32 %v343_v53, %v325_v20 }
  0x6d   : > { %v344_v57 = vsel %vm340_vm5, %v533_v48, %v342_v52 }
  0x6e   : > { %v356_v58 = vadd.f32 %v354_v54, %v350_v49  ;;  %v369_v59 = vmul.f32 %v344_v57, %v326_v21  ;;  %v380_v60 = vadd.f32 %v344_v57, %v343_v53 }
  0x70   : > { %v358_v61 = vadd.f32 %v356_v58, %v355_v55  ;;  %v370_v62 = vadd.f32 %v369_v59, %v368_v56  ;;  %v381_v63 = vrot.slane %v380_v60, 4 }
  0x72   : > { %v359_v0 = vrot.slane %v358_v61, 4  ;;  %v371_v1 = vrot.slane %v370_v62, 4  ;;  %v382_v2 = vadd.f32 %v381_v63, %v380_v60 }
  0x74   : > { %v360_v3 = vadd.f32 %v359_v0, %v358_v61  ;;  %v372_v4 = vadd.f32 %v371_v1, %v370_v62  ;;  %v383_v5 = vrot.slane %v382_v2, 2 }
  0x76   : > { %v361_v6 = vrot.slane %v360_v3, 2  ;;  %v373_v7 = vrot.slane %v372_v4, 2  ;;  %v384_v8 = vadd.f32 %v383_v5, %v382_v2 }
  0x78   : > { %v362_v9 = vadd.f32 %v361_v6, %v360_v3  ;;  %v374_v10 = vadd.f32 %v373_v7, %v372_v4  ;;  %v385_v11 = vrot.slane %v384_v8, 1 }
  0x7a   : > { %v363_v13 = vrot.slane %v362_v9, 1  ;;  %v375_v14 = vrot.slane %v374_v10, 1  ;;  %v386_v15 = vadd.f32 %v385_v11, %v384_v8 }
  0x7c   : > { %v364_v18 = vadd.f32 %v363_v13, %v362_v9  ;;  %v376_v19 = vadd.f32 %v375_v14, %v374_v10  ;;  %v387_v20 = vadd.f32 %v386_v15, %v379_v12 }
  0x7e   : > { %v365_v21 = vadd.f32 %v364_v18, %v357_v16  ;;  %v377_v22 = vadd.f32 %v376_v19, %v367_v17  ;;  %388 = vst [vmem:[%s603_s19 + $0x2] sm:$0x1] %v387_v20 }
  0x80   : > { %366 = vst [vmem:[%s603_s19] sm:$0x1] %v365_v21 }
  0x81   : > { %378 = vst [vmem:[%s603_s19 + $0x1] sm:$0x1] %v377_v22 }
  0x82 PF: > { %s12_s11 = sadd.s32 1, %s558_s11   ;;  %s655_s9 = smov %s554_s10 }
  0x83   : > { %p9_p9 = scmp.ge.s32.totalorder %s12_s11, 4   ;;  %s656_s10 = smov %s658_s12 }
  0x85   :  { %11 = sbr.rel (!%p9_p9) target bundleno = 2 (0x2), region = 73 }

</bundles_post_ra>
